<compile_context>
chip_gen: v7x
topology: tpu7x:2x2x1
jax: 0.10.0
libtpu: 0.0.40
codegen_flags: <defaults>
</compile_context>

<pallas_src>
import jax
import jax.numpy as jnp
from jax.experimental import pallas as pl
from jax.experimental.pallas import tpu as pltpu


_TARGET_BLOCK_BYTES = 4 << 20   # ~4 MiB blocks (amortizes per-step overhead on v7x)
_VMEM_LIMIT_BYTES = 40 << 20    # explicit headroom: 4 double-buffered 4 MiB blocks


def _flatten_copy_kernel(x_ref, o_ref):
    # The only "compute" a flatten performs: materialize the block.
    o_ref[...] = x_ref[...]


def _sublane_multiple(itemsize):
    # Packed sublane multiple per dtype: 8 for 32-bit, 16 for bf16, 32 for int8.
    return max(8, 32 // max(1, itemsize))


def _choose_slab_width(total, itemsize, sub):
    """Widest lane-dense width (multiple of 128) that divides `total`.

    Searches every multiple of 128 (not just powers of two). Capped so a
    (sub, W) block can never exceed the block-byte budget.
    """
    cap = (_TARGET_BLOCK_BYTES // (sub * itemsize)) // 128 * 128
    cap = max(128, min(16384, cap))
    for w in range(cap, 127, -128):
        if total % w == 0:
            return w
    return None


def _pick_col_tile(cols, itemsize, sub):
    """Lane tile (multiple of 128) for a lane-dense slab of width `cols`."""
    cap = (_TARGET_BLOCK_BYTES // (sub * itemsize)) // 128 * 128
    cap = max(128, cap)
    if cols <= cap:
        return cols
    # Prefer a multiple-of-128 divisor of cols -> no ragged last column block.
    for cand in range(cap, cap // 2, -128):
        if cols % cand == 0:
            return cand
    return cap


def _pick_row_tile(rows, tile_c, itemsize, sub):
    """Sublane tile: packed-sublane multiple, bounded by the block-byte budget,
    preferring divisors of `rows`, split so the grid has >= 2 steps (keeps
    v7x's second TensorCore busy) whenever the rows are splittable."""
    if rows <= sub:
        return rows  # block dim equal to the full array dim is always legal
    budget = max(sub, _TARGET_BLOCK_BYTES // (tile_c * itemsize))
    t = min(rows, budget)
    t = max(sub, (t // sub) * sub)
    if t >= rows:
        # Would collapse to a single grid step: split rows in two for v7x's
        # dual TensorCores (harmless on single-core v5e/v6e).
        half = pl.cdiv(rows, 2)
        t = max(sub, (half // sub) * sub)
    # Prefer a nearby divisor of rows -> no ragged (masked) last row block.
    for cand in range(t, max(sub, t // 2) - 1, -sub):
        if rows % cand == 0:
            return cand
    return t


def _materializing_copy_2d(slab):
    """Pallas copy of a 2D lane-dense slab (last dim a multiple of 128, or the
    whole width fits in a single lane tile)."""
    rows, cols = slab.shape
    itemsize = slab.dtype.itemsize
    sub = _sublane_multiple(itemsize)

    tile_c = _pick_col_tile(cols, itemsize, sub)
    tile_r = _pick_row_tile(rows, tile_c, itemsize, sub)
    grid = (pl.cdiv(rows, tile_r), pl.cdiv(cols, tile_c))

    return pl.pallas_call(
        _flatten_copy_kernel,
        out_shape=jax.ShapeDtypeStruct((rows, cols), slab.dtype),
        grid_spec=pltpu.PrefetchScalarGridSpec(
            num_scalar_prefetch=0,
            grid=grid,
            in_specs=[pl.BlockSpec((tile_r, tile_c), lambda i, j: (i, j))],
            out_specs=pl.BlockSpec((tile_r, tile_c), lambda i, j: (i, j)),
        ),
        compiler_params=pltpu.CompilerParams(
            dimension_semantics=("parallel", "parallel"),
            vmem_limit_bytes=_VMEM_LIMIT_BYTES,
        ),
        cost_estimate=pl.CostEstimate(
            flops=0, transcendentals=0, bytes_accessed=2 * rows * cols * itemsize
        ),
    )(slab)


def flatten_layer(x, num_features: int, *, materialize: bool = True):
    """Pallas implementation of FlattenLayer(num_features).forward(x)."""
    total = x.size
    assert total % num_features == 0, "input size must be divisible by num_features"
    rows = total // num_features

    if not materialize:
        # Fastest possible answer: a flatten is a metadata-only view.
        return jnp.reshape(x, (rows, num_features))

    itemsize = x.dtype.itemsize
    sub = _sublane_multiple(itemsize)

    W = _choose_slab_width(total, itemsize, sub)
    if W is not None:
        # Main path: lane-dense slab view (zero-cost reshape) tiled over rows.
        slab = jnp.reshape(x, (total // W, W))
        out2d = _materializing_copy_2d(slab)
        return jnp.reshape(out2d, (rows, num_features))

    # Fallback: total not a multiple of 128. Pad the feature axis to a
    # 128-multiple so stores stay unmasked and block bytes stay bounded
    # (prevents the unbounded-VMEM fallback of the previous version), then
    # slice the pad back off.
    flat2d = jnp.reshape(x, (rows, num_features))
    pad = (-num_features) % 128
    slab = jnp.pad(flat2d, ((0, 0), (0, pad)))
    out2d = _materializing_copy_2d(slab)
    return out2d[:, :num_features]


if __name__ == "__main__":
    key = jax.random.PRNGKey(0)

    # Small NCHW input consistent with what FlattenLayer sees after a conv
    # stack: batch=2, channels=4, spatial=16x16 -> num_features=1024.
    N, C, H, Wd = 2, 4, 16, 16
    num_features = C * H * Wd  # 1024
    x = jax.random.normal(key, (N, C, H, Wd), dtype=jnp.float32)

    out = jax.block_until_ready(flatten_layer(x, num_features))
    ref = jnp.reshape(x, (-1, num_features))
    assert out.shape == (N, num_features), out.shape
    assert out.dtype == x.dtype
    assert jnp.array_equal(out, ref), "mismatch on lane-dense main path"

    # Non-power-of-two feature count (exercises the widened 128-multiple search).
    x2 = jax.random.normal(key, (2, 3, 8, 16), dtype=jnp.float32)  # nf = 384
    out2 = jax.block_until_ready(flatten_layer(x2, 3 * 8 * 16))
    assert jnp.array_equal(out2, jnp.reshape(x2, (-1, 3 * 8 * 16)))

    # Feature count whose total is not a multiple of 128 (bounded fallback path).
    x3 = jax.random.normal(key, (2, 3, 2, 2), dtype=jnp.float32)   # nf = 12
    out3 = jax.block_until_ready(flatten_layer(x3, 12))
    assert jnp.array_equal(out3, jnp.reshape(x3, (-1, 12)))

    print("KERNEL_OK")
</pallas_src>

<mosaic_0001>
module attributes {stable_mosaic.version = 11 : i64} {
  func.func @_flatten_copy_kernel(%arg0: i32, %arg1: i32, %arg2: memref<1x2048xf32, #tpu.memory_space<vmem>>, %arg3: memref<1x2048xf32, #tpu.memory_space<vmem>>) attributes {dimension_semantics = [#tpu.dimension_semantics<parallel>, #tpu.dimension_semantics<parallel>], iteration_bounds = array<i64: 1, 1>, scalar_prefetch = 0 : i64, scratch_operands = 0 : i64, tpu.core_type = #tpu.core_type<tc>, window_params = [{transform_indices = @transform_0, window_bounds = array<i64: 1, 2048>}, {transform_indices = @transform_1, window_bounds = array<i64: 1, 2048>}]} {
    %c0 = arith.constant 0 : index
    %c0_0 = arith.constant 0 : index
    %0 = vector.load %arg2[%c0, %c0_0] : memref<1x2048xf32, #tpu.memory_space<vmem>>, vector<1x2048xf32>
    %c0_1 = arith.constant 0 : index
    %c0_2 = arith.constant 0 : index
    %1 = vector.load %arg3[%c0_1, %c0_2] : memref<1x2048xf32, #tpu.memory_space<vmem>>, vector<1x2048xf32>
    tpu.vector_store %arg3[%c0_1, %c0_2], %0 {strides = array<i32>} : memref<1x2048xf32, #tpu.memory_space<vmem>>, vector<1x2048xf32>,
    return
  }
  func.func @transform_0(%arg0: i32, %arg1: i32) -> (i32, i32) {
    %c0_i32 = arith.constant 0 : i32
    return %arg0, %arg1 : i32, i32
  }
  func.func @transform_1(%arg0: i32, %arg1: i32) -> (i32, i32) {
    %c0_i32 = arith.constant 0 : i32
    return %arg0, %arg1 : i32, i32
  }
}

</mosaic_0001>

<bundles_post_ra>
// kernel: tpu_custom_call.1
= control target key start
LH: loop header
LB: loop body
LE: loop exit
PB: predicated region body
PF: predicated region fallthrough
CT: control target
= control target key end

     0   :  { %6 = vsyncpa [#allocation3], 0  ;;  %s126_s0 = inlined_call_operand.hbm [shape: f32[1,2048], index: 0, kind: input, shape index: {}]   ;;  %s127_s1 = inlined_call_operand.hbm [shape: f32[1,2048], index: 1, kind: output, shape index: {}]  }
   0x1   :  { %7 = vsyncpa [#allocation4], 0  ;;  %s90_s6 = smov [#allocation2]   ;;  %s42_s10 = scalar_lea.hbm %s126_s0, 256 }
   0x2   :  { %s14_s7 = sshll.u32 %s90_s6, 4  ;;  %p43_p0 = scmp.ne.s32.totalorder %s126_s0, %s42_s10  ;;  %s15_s7 = int_to_ptr.vmem [resolvable:$true] %s14_s7 }
   0x3   :  { %p46_p1 = scmp.lt.u32.totalorder %s42_s10, %s126_s0 }
   0x5   :  { %p48_p2 = pnand %p46_p1, %p43_p0 }
   0x7   :  { %51 = shalt.err (!%p48_p2)
}
   0x8   :  { %s52_s15 = scalar_lea.vmem %s15_s7, 256  ;;  %p57_p4 = scmp.lt.s32.totalorder %s15_s7, %s15_s7 }
   0x9   :  { %p53_p3 = scmp.ne.s32.totalorder %s15_s7, %s52_s15  ;;  %p58_p5 = scmp.lt.s32.totalorder %s52_s15, %s52_s15 }
   0xb   :  { %p59_p6 = por %p58_p5, %p57_p4 }
   0xd   :  { %p60_p7 = pnand %p59_p6, %p53_p3 }
   0xf   :  { %63 = shalt.err (!%p60_p7)
}
  0x10   :  { %17 = dma.hbm_to_vmem [thread:$0]  %s126_s0, 256, %s15_s7, [#allocation3]  }
  0x11   :  { %86 = dma.done.wait [#allocation3], 256  }
  0x12   :  { %87 = vsyncadd [#allocation3], 4294967040  ;;  %s91_s18 = smov [#allocation5]   ;;  %v21_v0 = vld [vmem:[#allocation2] sm:$0xff]  ;;  %v22_v1 = vld [vmem:[#allocation2 + $0x8] sm:$0xff] }
  0x13   :  { %s31_s19 = sshll.u32 %s91_s18, 4  ;;  %23 = vst [vmem:[#allocation5] sm:$0xff] %v21_v0  ;;  %24 = vst [vmem:[#allocation5 + $0x8] sm:$0xff] %v22_v1  ;;  %s32_s19 = int_to_ptr.vmem [resolvable:$true] %s31_s19 }
  0x14   :  { %s64_s20 = scalar_lea.vmem %s32_s19, 256  ;;  %p69_p9 = scmp.lt.s32.totalorder %s32_s19, %s32_s19 }
  0x15   :  { %p65_p8 = scmp.ne.s32.totalorder %s32_s19, %s64_s20  ;;  %p70_p10 = scmp.lt.s32.totalorder %s64_s20, %s64_s20 }
  0x17   :  { %p71_p11 = por %p70_p10, %p69_p9 }
  0x19   :  { %p72_p12 = pnand %p71_p11, %p65_p8 }
  0x1b   :  { %75 = shalt.err (!%p72_p12)
}
  0x1c   :  { %s76_s0 = scalar_lea.hbm %s127_s1, 256 }
  0x1d   :  { %p77_p13 = scmp.ne.s32.totalorder %s127_s1, %s76_s0  ;;  %p80_p0 = scmp.lt.u32.totalorder %s76_s0, %s127_s1 }
  0x1f   :  { %p82_p1 = pnand %p80_p0, %p77_p13 }
  0x21   :  { %85 = shalt.err (!%p82_p1)
}
  0x22   :  { %34 = dma.vmem_to_hbm [thread:$0]  %s32_s19, 256, %s127_s1, [#allocation4]  }
  0x23   :  { %88 = dma.done.wait [#allocation4], 256  }
  0x24   :  { %89 = vsyncadd [#allocation4], 4294967040 }
  0x25   :  { %38 = vsyncpa [#allocation3], 1 }
  0x26   :  { %39 = vsyncpa [#allocation4], 1 }

</bundles_post_ra>
